<compile_context>
chip_gen: v6e
topology: v6e:2x2x1
jax: 0.10.0
libtpu: 0.0.40
codegen_flags: <defaults>
</compile_context>

<pallas_src>
import functools

import jax
import jax.numpy as jnp
import numpy as np
from jax.experimental import pallas as pl
from jax.experimental.pallas import tpu as pltpu

# ----------------------------- model sizes ---------------------------------
B = 2            # batch
HP = WP = 4      # spatial patches
T = 3            # timesteps
G_ST = 2         # space-time channel groups
G_SP = 2         # space-only channel groups
G_T = 2          # time-only channel groups
G_STATIC = 2     # static channel groups
C_IN = 16        # raw per-token feature dim
D = 32           # encoder embedding dim
HID = 64         # encoder MLP hidden dim
OUT = 8          # head output dim
BASE_GSD = 10

N_ST = HP * WP * T * G_ST       # 96
N_SP = HP * WP * G_SP           # 32
N_T = T * G_T                   # 6
N_STATIC = G_STATIC             # 2
N_TOK = N_ST + N_SP + N_T + N_STATIC       # 136
N_PAD = ((N_TOK + 7) // 8) * 8             # 136 (already sublane-aligned)


# ----------------------------- fused Pallas kernel ---------------------------
def _fused_kernel(x_ref, pe_ref, keepw_ref,
                  wemb_ref, bemb_ref, w1_ref, b1_ref, w2_ref, b2_ref,
                  wh_ref, bh_ref, out_ref):
    """Per-batch: encoder block + masked-mean pooling (as MXU matvec) + head.

    x_ref     : (1, N_PAD, C_IN)   raw tokens
    pe_ref    : (1, N_PAD, D)      frozen pos+month embeddings
    keepw_ref : (1, 1, N_PAD)      keep-mask already scaled by 1/count
    weights   : whole arrays, VMEM-resident
    out_ref   : (1, 1, OUT)
    """
    x = x_ref[0]                                              # (N_PAD, C_IN)
    e = (jnp.dot(x, wemb_ref[...], preferred_element_type=jnp.float32)
         + bemb_ref[...] + pe_ref[0])                         # (N_PAD, D)
    h = jax.nn.gelu(
        jnp.dot(e, w1_ref[...], preferred_element_type=jnp.float32) + b1_ref[...],
        approximate=True)                                     # (N_PAD, HID)
    enc = (e
           + jnp.dot(h, w2_ref[...], preferred_element_type=jnp.float32)
           + b2_ref[...])                                     # (N_PAD, D)
    # masked mean as an MXU matmul: (1, N_PAD) x (N_PAD, D) -> (1, D)
    pooled = jnp.dot(keepw_ref[0], enc, preferred_element_type=jnp.float32)
    out_ref[0] = (jnp.dot(pooled, wh_ref[...], preferred_element_type=jnp.float32)
                  + bh_ref[...])                              # (1, OUT)


def _run_fused(x, pe, keep_w, params):
    """x: [B, N_PAD, C_IN], pe: [B, N_PAD, D], keep_w: [B, 1, N_PAD] -> [B, OUT]."""
    full2d = lambda shp: pl.BlockSpec(shp, lambda b: (0, 0))
    out = pl.pallas_call(
        _fused_kernel,
        out_shape=jax.ShapeDtypeStruct((B, 1, OUT), jnp.float32),
        grid=(B,),
        in_specs=[pl.BlockSpec((1, N_PAD, C_IN), lambda b: (b, 0, 0)),
                  pl.BlockSpec((1, N_PAD, D), lambda b: (b, 0, 0)),
                  pl.BlockSpec((1, 1, N_PAD), lambda b: (b, 0, 0)),
                  full2d((C_IN, D)), full2d((1, D)),
                  full2d((D, HID)), full2d((1, HID)),
                  full2d((HID, D)), full2d((1, D)),
                  full2d((D, OUT)), full2d((1, OUT))],
        out_specs=pl.BlockSpec((1, 1, OUT), lambda b: (b, 0, 0)),
        compiler_params=pltpu.CompilerParams(dimension_semantics=("parallel",)),
    )(x, pe, keep_w,
      params["w_emb"], params["b_emb"],
      params["w1"], params["b1"],
      params["w2"], params["b2"],
      params["w_head"], params["b_head"])
    return out.reshape(B, OUT)


# ----------------------------- glue (plain JAX) ------------------------------
def _flatten_tokens(s_t_x, sp_x, t_x, st_x, s_t_m, sp_m, t_m, st_m, months, params):
    """Collapse all modality groups into [B, N_PAD, C_IN] + keep weights + frozen embeds."""
    tok_st = s_t_x.reshape(B, N_ST, C_IN)
    tok_sp = sp_x.reshape(B, N_SP, C_IN)
    tok_t = t_x.reshape(B, N_T, C_IN)
    tok_static = st_x.reshape(B, N_STATIC, C_IN)
    x = jnp.concatenate([tok_st, tok_sp, tok_t, tok_static], axis=1)   # [B, N_TOK, C_IN]

    m = jnp.concatenate([s_t_m.reshape(B, N_ST),
                         sp_m.reshape(B, N_SP),
                         t_m.reshape(B, N_T),
                         st_m.reshape(B, N_STATIC)], axis=1)           # [B, N_TOK]
    keep = (m == 0).astype(jnp.float32)                                # token participates

    # frozen positional + month embeddings (requires_grad_(False) in the module)
    pos = params["pos_embed"][:N_TOK]                                  # [N_TOK, D]
    m_emb = params["month_embed"][months]                              # [B, T, D]
    mc_st = jnp.broadcast_to(m_emb[:, None, None, :, None, :],
                             (B, HP, WP, T, G_ST, D)).reshape(B, N_ST, D)
    mc_sp = jnp.zeros((B, N_SP, D), jnp.float32)
    mc_t = jnp.broadcast_to(m_emb[:, :, None, :], (B, T, G_T, D)).reshape(B, N_T, D)
    mc_static = jnp.zeros((B, N_STATIC, D), jnp.float32)
    month_contrib = jnp.concatenate([mc_st, mc_sp, mc_t, mc_static], axis=1)
    pe = pos[None, :, :] + month_contrib                               # [B, N_TOK, D]

    pad = N_PAD - N_TOK
    if pad:
        x = jnp.pad(x, ((0, 0), (0, pad), (0, 0)))
        pe = jnp.pad(pe, ((0, 0), (0, pad), (0, 0)))
        keep = jnp.pad(keep, ((0, 0), (0, pad)))                       # padded tokens excluded
    return x, pe, keep


def _keep_weights(keep):
    """Fold the masked-mean reciprocal into the keep row: [B, 1, N_PAD]."""
    cnt = jnp.maximum(jnp.sum(keep, axis=1, keepdims=True), 1.0)       # [B, 1]
    return (keep / cnt)[:, None, :]                                    # [B, 1, N_PAD]


@functools.partial(jax.jit, static_argnames=("patch_size", "input_resolution_m"))
def finetuning_forward(params, s_t_x, sp_x, t_x, st_x,
                       s_t_m, sp_m, t_m, st_m, months,
                       patch_size=None, input_resolution_m=BASE_GSD):
    # patch_size / input_resolution_m accepted for API parity; the synthetic
    # encoder does not re-tokenize at a different GSD.
    x, pe, keep = _flatten_tokens(s_t_x, sp_x, t_x, st_x,
                                  s_t_m, sp_m, t_m, st_m, months, params)
    return _run_fused(x, pe, _keep_weights(keep), params)


# ----------------------------- reference (pure JAX) --------------------------
def finetuning_reference(params, s_t_x, sp_x, t_x, st_x,
                         s_t_m, sp_m, t_m, st_m, months):
    x, pe, keep = _flatten_tokens(s_t_x, sp_x, t_x, st_x,
                                  s_t_m, sp_m, t_m, st_m, months, params)
    e = x @ params["w_emb"] + params["b_emb"] + pe
    h = jax.nn.gelu(e @ params["w1"] + params["b1"], approximate=True)
    enc = e + h @ params["w2"] + params["b2"]
    k = keep[..., None]
    pooled = (enc * k).sum(axis=1) / jnp.maximum(k.sum(axis=1), 1.0)
    return pooled @ params["w_head"] + params["b_head"]


# ----------------------------- params & main --------------------------------
def init_params(key):
    ks = jax.random.split(key, 8)
    s = lambda k, shp, scale: (scale * jax.random.normal(k, shp)).astype(jnp.float32)
    return {
        "pos_embed": s(ks[0], (N_PAD, D), 0.02),        # frozen
        "month_embed": s(ks[1], (12, D), 0.02),          # frozen
        "w_emb": s(ks[2], (C_IN, D), 0.1),
        "b_emb": jnp.zeros((1, D), jnp.float32),
        "w1": s(ks[3], (D, HID), 0.1),
        "b1": jnp.zeros((1, HID), jnp.float32),
        "w2": s(ks[4], (HID, D), 0.1),
        "b2": jnp.zeros((1, D), jnp.float32),
        "w_head": s(ks[5], (D, OUT), 0.1),
        "b_head": jnp.zeros((1, OUT), jnp.float32),
    }


if __name__ == "__main__":
    root = jax.random.PRNGKey(0)
    kp, k1, k2, k3, k4, km, kmask = jax.random.split(root, 7)
    params = init_params(kp)

    s_t_x = jax.random.normal(k1, (B, HP, WP, T, G_ST, C_IN), jnp.float32)
    sp_x = jax.random.normal(k2, (B, HP, WP, G_SP, C_IN), jnp.float32)
    t_x = jax.random.normal(k3, (B, T, G_T, C_IN), jnp.float32)
    st_x = jax.random.normal(k4, (B, G_STATIC, C_IN), jnp.float32)

    # masks: 0 = token kept, 1 = token excluded from the average
    s_t_m = (jax.random.uniform(kmask, (B, HP, WP, T, G_ST)) < 0.1).astype(jnp.float32)
    sp_m = jnp.zeros((B, HP, WP, G_SP), jnp.float32)
    t_m = jnp.zeros((B, T, G_T), jnp.float32)
    st_m = jnp.zeros((B, G_STATIC), jnp.float32)
    months = jax.random.randint(km, (B, T), 0, 12, jnp.int32)

    out = finetuning_forward(params, s_t_x, sp_x, t_x, st_x,
                             s_t_m, sp_m, t_m, st_m, months)
    out = jax.block_until_ready(out)

    ref = finetuning_reference(params, s_t_x, sp_x, t_x, st_x,
                               s_t_m, sp_m, t_m, st_m, months)
    np.testing.assert_allclose(np.asarray(out), np.asarray(ref), rtol=1e-4, atol=1e-4)
    assert out.shape == (B, OUT)
    print("KERNEL_OK")
</pallas_src>

<mosaic_0001>
module attributes {stable_mosaic.version = 11 : i64} {
  func.func @_fused_kernel(%arg0: i32, %arg1: memref<1x136x16xf32, #tpu.memory_space<vmem>>, %arg2: memref<1x136x32xf32, #tpu.memory_space<vmem>>, %arg3: memref<1x1x136xf32, #tpu.memory_space<vmem>>, %arg4: memref<16x32xf32, #tpu.memory_space<vmem>>, %arg5: memref<1x32xf32, #tpu.memory_space<vmem>>, %arg6: memref<32x64xf32, #tpu.memory_space<vmem>>, %arg7: memref<1x64xf32, #tpu.memory_space<vmem>>, %arg8: memref<64x32xf32, #tpu.memory_space<vmem>>, %arg9: memref<1x32xf32, #tpu.memory_space<vmem>>, %arg10: memref<32x8xf32, #tpu.memory_space<vmem>>, %arg11: memref<1x8xf32, #tpu.memory_space<vmem>>, %arg12: memref<1x1x8xf32, #tpu.memory_space<vmem>>) attributes {dimension_semantics = [#tpu.dimension_semantics<parallel>], iteration_bounds = array<i64: 2>, scalar_prefetch = 0 : i64, scratch_operands = 0 : i64, tpu.core_type = #tpu.core_type<tc>, window_params = [{transform_indices = @transform_0, window_bounds = array<i64: 1, 136, 16>}, {transform_indices = @transform_1, window_bounds = array<i64: 1, 136, 32>}, {transform_indices = @transform_2, window_bounds = array<i64: 1, 1, 136>}, {pipeline_mode = #tpu.pipeline_mode<synchronous>, transform_indices = @transform_3, window_bounds = array<i64: 16, 32>}, {pipeline_mode = #tpu.pipeline_mode<synchronous>, transform_indices = @transform_4, window_bounds = array<i64: 1, 32>}, {pipeline_mode = #tpu.pipeline_mode<synchronous>, transform_indices = @transform_5, window_bounds = array<i64: 32, 64>}, {pipeline_mode = #tpu.pipeline_mode<synchronous>, transform_indices = @transform_6, window_bounds = array<i64: 1, 64>}, {pipeline_mode = #tpu.pipeline_mode<synchronous>, transform_indices = @transform_7, window_bounds = array<i64: 64, 32>}, {pipeline_mode = #tpu.pipeline_mode<synchronous>, transform_indices = @transform_8, window_bounds = array<i64: 1, 32>}, {pipeline_mode = #tpu.pipeline_mode<synchronous>, transform_indices = @transform_9, window_bounds = array<i64: 32, 8>}, {pipeline_mode = #tpu.pipeline_mode<synchronous>, transform_indices = @transform_10, window_bounds = array<i64: 1, 8>}, {transform_indices = @transform_11, window_bounds = array<i64: 1, 1, 8>}]} {
    %c0 = arith.constant 0 : index
    %c0_0 = arith.constant 0 : index
    %c0_1 = arith.constant 0 : index
    %0 = vector.load %arg1[%c0, %c0_0, %c0_1] : memref<1x136x16xf32, #tpu.memory_space<vmem>>, vector<1x136x16xf32>
    %1 = vector.shape_cast %0 : vector<1x136x16xf32> to vector<136x16xf32>
    %c0_2 = arith.constant 0 : index
    %c0_3 = arith.constant 0 : index
    %2 = vector.load %arg4[%c0_2, %c0_3] : memref<16x32xf32, #tpu.memory_space<vmem>>, vector<16x32xf32>
    %cst = arith.constant dense<0.000000e+00> : vector<136x32xf32>
    %3 = tpu.matmul %1, %2, %cst {dimension_numbers = #tpu.dot_dimension_numbers<[1], [0], [0], [1], [0, 0, 1, 1], [], []>} : vector<136x16xf32>, vector<16x32xf32>, vector<136x32xf32> -> vector<136x32xf32>
    %c0_4 = arith.constant 0 : index
    %c0_5 = arith.constant 0 : index
    %4 = vector.load %arg5[%c0_4, %c0_5] : memref<1x32xf32, #tpu.memory_space<vmem>>, vector<1x32xf32>
    %5 = vector.broadcast %4 : vector<1x32xf32> to vector<136x32xf32>
    %6 = arith.addf %3, %5 : vector<136x32xf32>
    %c0_6 = arith.constant 0 : index
    %c0_7 = arith.constant 0 : index
    %c0_8 = arith.constant 0 : index
    %7 = vector.load %arg2[%c0_6, %c0_7, %c0_8] : memref<1x136x32xf32, #tpu.memory_space<vmem>>, vector<1x136x32xf32>
    %8 = vector.shape_cast %7 : vector<1x136x32xf32> to vector<136x32xf32>
    %9 = arith.addf %6, %8 : vector<136x32xf32>
    %c0_9 = arith.constant 0 : index
    %c0_10 = arith.constant 0 : index
    %10 = vector.load %arg6[%c0_9, %c0_10] : memref<32x64xf32, #tpu.memory_space<vmem>>, vector<32x64xf32>
    %cst_11 = arith.constant dense<0.000000e+00> : vector<136x64xf32>
    %11 = tpu.matmul %9, %10, %cst_11 {dimension_numbers = #tpu.dot_dimension_numbers<[1], [0], [0], [1], [0, 0, 1, 1], [], []>} : vector<136x32xf32>, vector<32x64xf32>, vector<136x64xf32> -> vector<136x64xf32>
    %c0_12 = arith.constant 0 : index
    %c0_13 = arith.constant 0 : index
    %12 = vector.load %arg7[%c0_12, %c0_13] : memref<1x64xf32, #tpu.memory_space<vmem>>, vector<1x64xf32>
    %13 = vector.broadcast %12 : vector<1x64xf32> to vector<136x64xf32>
    %14 = arith.addf %11, %13 : vector<136x64xf32>
    %15 = arith.mulf %14, %14 : vector<136x64xf32>
    %16 = arith.mulf %14, %15 : vector<136x64xf32>
    %cst_14 = arith.constant 4.471500e-02 : f32
    %17 = vector.broadcast %cst_14 : f32 to vector<136x64xf32>
    %18 = arith.mulf %17, %16 : vector<136x64xf32>
    %19 = arith.addf %14, %18 : vector<136x64xf32>
    %cst_15 = arith.constant 0.797884583 : f32
    %20 = vector.broadcast %cst_15 : f32 to vector<136x64xf32>
    %21 = arith.mulf %20, %19 : vector<136x64xf32>
    %22 = math.tanh %21 : vector<136x64xf32>
    %cst_16 = arith.constant 1.000000e+00 : f32
    %23 = vector.broadcast %cst_16 : f32 to vector<136x64xf32>
    %24 = arith.addf %23, %22 : vector<136x64xf32>
    %cst_17 = arith.constant 5.000000e-01 : f32
    %25 = vector.broadcast %cst_17 : f32 to vector<136x64xf32>
    %26 = arith.mulf %25, %24 : vector<136x64xf32>
    %27 = arith.mulf %14, %26 : vector<136x64xf32>
    %c0_18 = arith.constant 0 : index
    %c0_19 = arith.constant 0 : index
    %28 = vector.load %arg8[%c0_18, %c0_19] : memref<64x32xf32, #tpu.memory_space<vmem>>, vector<64x32xf32>
    %cst_20 = arith.constant dense<0.000000e+00> : vector<136x32xf32>
    %29 = tpu.matmul %27, %28, %cst_20 {dimension_numbers = #tpu.dot_dimension_numbers<[1], [0], [0], [1], [0, 0, 1, 1], [], []>} : vector<136x64xf32>, vector<64x32xf32>, vector<136x32xf32> -> vector<136x32xf32>
    %30 = arith.addf %9, %29 : vector<136x32xf32>
    %c0_21 = arith.constant 0 : index
    %c0_22 = arith.constant 0 : index
    %31 = vector.load %arg9[%c0_21, %c0_22] : memref<1x32xf32, #tpu.memory_space<vmem>>, vector<1x32xf32>
    %32 = vector.broadcast %31 : vector<1x32xf32> to vector<136x32xf32>
    %33 = arith.addf %30, %32 : vector<136x32xf32>
    %c0_23 = arith.constant 0 : index
    %c0_24 = arith.constant 0 : index
    %c0_25 = arith.constant 0 : index
    %34 = vector.load %arg3[%c0_23, %c0_24, %c0_25] : memref<1x1x136xf32, #tpu.memory_space<vmem>>, vector<1x1x136xf32>
    %35 = vector.shape_cast %34 : vector<1x1x136xf32> to vector<1x136xf32>
    %cst_26 = arith.constant dense<0.000000e+00> : vector<1x32xf32>
    %36 = tpu.matmul %35, %33, %cst_26 {dimension_numbers = #tpu.dot_dimension_numbers<[1], [0], [0], [1], [0, 0, 1, 1], [], []>} : vector<1x136xf32>, vector<136x32xf32>, vector<1x32xf32> -> vector<1x32xf32>
    %c0_27 = arith.constant 0 : index
    %c0_28 = arith.constant 0 : index
    %37 = vector.load %arg10[%c0_27, %c0_28] : memref<32x8xf32, #tpu.memory_space<vmem>>, vector<32x8xf32>
    %cst_29 = arith.constant dense<0.000000e+00> : vector<1x8xf32>
    %38 = tpu.matmul %36, %37, %cst_29 {dimension_numbers = #tpu.dot_dimension_numbers<[1], [0], [0], [1], [0, 0, 1, 1], [], []>} : vector<1x32xf32>, vector<32x8xf32>, vector<1x8xf32> -> vector<1x8xf32>
    %c0_30 = arith.constant 0 : index
    %c0_31 = arith.constant 0 : index
    %39 = vector.load %arg11[%c0_30, %c0_31] : memref<1x8xf32, #tpu.memory_space<vmem>>, vector<1x8xf32>
    %40 = arith.addf %38, %39 : vector<1x8xf32>
    %c0_32 = arith.constant 0 : index
    %c0_33 = arith.constant 0 : index
    %c0_34 = arith.constant 0 : index
    %41 = vector.load %arg12[%c0_32, %c0_33, %c0_34] : memref<1x1x8xf32, #tpu.memory_space<vmem>>, vector<1x1x8xf32>
    %42 = vector.shape_cast %41 : vector<1x1x8xf32> to vector<1x8xf32>
    %43 = vector.shape_cast %40 : vector<1x8xf32> to vector<1x1x8xf32>
    tpu.vector_store %arg12[%c0_32, %c0_33, %c0_34], %43 {strides = array<i32>} : memref<1x1x8xf32, #tpu.memory_space<vmem>>, vector<1x1x8xf32>,
    return
  }
  func.func @transform_0(%arg0: i32) -> (i32, i32, i32) {
    %c0_i32 = arith.constant 0 : i32
    %c0_i32_0 = arith.constant 0 : i32
    %c0_i32_1 = arith.constant 0 : i32
    return %arg0, %c0_i32, %c0_i32_0 : i32, i32, i32
  }
  func.func @transform_1(%arg0: i32) -> (i32, i32, i32) {
    %c0_i32 = arith.constant 0 : i32
    %c0_i32_0 = arith.constant 0 : i32
    %c0_i32_1 = arith.constant 0 : i32
    return %arg0, %c0_i32, %c0_i32_0 : i32, i32, i32
  }
  func.func @transform_2(%arg0: i32) -> (i32, i32, i32) {
    %c0_i32 = arith.constant 0 : i32
    %c0_i32_0 = arith.constant 0 : i32
    %c0_i32_1 = arith.constant 0 : i32
    return %arg0, %c0_i32, %c0_i32_0 : i32, i32, i32
  }
  func.func @transform_3(%arg0: i32) -> (i32, i32) {
    %c0_i32 = arith.constant 0 : i32
    %c0_i32_0 = arith.constant 0 : i32
    %c0_i32_1 = arith.constant 0 : i32
    return %c0_i32, %c0_i32_0 : i32, i32
  }
  func.func @transform_4(%arg0: i32) -> (i32, i32) {
    %c0_i32 = arith.constant 0 : i32
    %c0_i32_0 = arith.constant 0 : i32
    %c0_i32_1 = arith.constant 0 : i32
    return %c0_i32, %c0_i32_0 : i32, i32
  }
  func.func @transform_5(%arg0: i32) -> (i32, i32) {
    %c0_i32 = arith.constant 0 : i32
    %c0_i32_0 = arith.constant 0 : i32
    %c0_i32_1 = arith.constant 0 : i32
    return %c0_i32, %c0_i32_0 : i32, i32
  }
  func.func @transform_6(%arg0: i32) -> (i32, i32) {
    %c0_i32 = arith.constant 0 : i32
    %c0_i32_0 = arith.constant 0 : i32
    %c0_i32_1 = arith.constant 0 : i32
    return %c0_i32, %c0_i32_0 : i32, i32
  }
  func.func @transform_7(%arg0: i32) -> (i32, i32) {
    %c0_i32 = arith.constant 0 : i32
    %c0_i32_0 = arith.constant 0 : i32
    %c0_i32_1 = arith.constant 0 : i32
    return %c0_i32, %c0_i32_0 : i32, i32
  }
  func.func @transform_8(%arg0: i32) -> (i32, i32) {
    %c0_i32 = arith.constant 0 : i32
    %c0_i32_0 = arith.constant 0 : i32
    %c0_i32_1 = arith.constant 0 : i32
    return %c0_i32, %c0_i32_0 : i32, i32
  }
  func.func @transform_9(%arg0: i32) -> (i32, i32) {
    %c0_i32 = arith.constant 0 : i32
    %c0_i32_0 = arith.constant 0 : i32
    %c0_i32_1 = arith.constant 0 : i32
    return %c0_i32, %c0_i32_0 : i32, i32
  }
  func.func @transform_10(%arg0: i32) -> (i32, i32) {
    %c0_i32 = arith.constant 0 : i32
    %c0_i32_0 = arith.constant 0 : i32
    %c0_i32_1 = arith.constant 0 : i32
    return %c0_i32, %c0_i32_0 : i32, i32
  }
  func.func @transform_11(%arg0: i32) -> (i32, i32, i32) {
    %c0_i32 = arith.constant 0 : i32
    %c0_i32_0 = arith.constant 0 : i32
    %c0_i32_1 = arith.constant 0 : i32
    return %arg0, %c0_i32, %c0_i32_0 : i32, i32, i32
  }
}

</mosaic_0001>

<bundles_post_ra>
// kernel: finetuning_forward.1
= control target key start
LH: loop header
LB: loop body
LE: loop exit
PB: predicated region body
PF: predicated region fallthrough
CT: control target
= control target key end

     0   :  { %s2763_s0 = inlined_call_operand.vmem [shape: f32[2,136,16], index: 0, kind: input, shape index: {}]   ;;  %s2764_s1 = inlined_call_operand.vmem [shape: f32[2,136,32], index: 1, kind: input, shape index: {}]   ;;  %s2765_s2 = inlined_call_operand.vmem [shape: f32[2,1,136], index: 2, kind: input, shape index: {}]   ;;  %s2766_s3 = inlined_call_operand.vmem [shape: f32[16,32], index: 3, kind: input, shape index: {}]   ;;  %s2767_s4 = inlined_call_operand.vmem [shape: f32[1,32], index: 4, kind: input, shape index: {}]   ;;  %s2768_s5 = inlined_call_operand.vmem [shape: f32[32,64], index: 5, kind: input, shape index: {}]   ;;  %s2769_s6 = inlined_call_operand.vmem [shape: f32[1,64], index: 6, kind: input, shape index: {}]   ;;  %s2770_s7 = inlined_call_operand.vmem [shape: f32[64,32], index: 7, kind: input, shape index: {}]   ;;  %s2771_s8 = inlined_call_operand.vmem [shape: f32[1,32], index: 8, kind: input, shape index: {}]   ;;  %s2772_s9 = inlined_call_operand.vmem [shape: f32[32,8], index: 9, kind: input, shape index: {}]   ;;  %s2773_s10 = inlined_call_operand.vmem [shape: f32[1,8], index: 10, kind: input, shape index: {}]   ;;  %s2774_s11 = inlined_call_operand.hbm [shape: f32[2,1,8], index: 11, kind: output, shape index: {}]  }
   0x1   :  { %2775 = sst [smem:[#allocation5_spill]] %s2763_s0 }
   0x2   :  { %16 = vsyncpa [#allocation3], 0 }
   0x3   :  { %18 = vsyncpa [#allocation3 + $0x1], 0  ;;  %s2089_s17 = smov 0   ;;  %s2091_s18 = smov 0  }
   0x4   :  { %s2093_s19 = smov 0   ;;  %s2095_s20 = smov 0  }
   0x5 LB: > { %s2110_s21 = sadd.s32 4294967295, %s2024_s20   ;;  %s1556_s22 = sadd.s32 4294967294, %s2024_s20   ;;  %s2024_s20 = sphi %s2095_s20, %s2782_s20   ;;  %s2020_s19 = sphi %s2093_s19, %s2781_s19   ;;  %s2016_s18 = sphi %s2091_s18, %s2780_s18   ;;  %s2012_s17 = sphi %s2089_s17, %s2779_s17  }
   0x6   : > { %s2114_s23 = sadd.s32 1, %s2024_s20   ;;  %s277_s24 = sadd.s32 1, %s2020_s19 }
   0x7   : > { %s274_s25 = ssub.s32 %s2024_s20, %s2114_s23  ;;  %p287_p0 = scmp.ne.s32.totalorder %s2020_s19, %s2016_s18 }
   0x8   : > { %p275_p1 = scmp.eq.s32.totalorder %s274_s25, 0  ;;  %p288_p2 = scmp.eq.s32.totalorder %s2110_s21, 1 }
   0x9   : > { %p293_p3 = scmp.ne.s32.totalorder %s2016_s18, %s2012_s17  ;;  %p294_p4 = scmp.eq.s32.totalorder %s1556_s22, 1 }
   0xa   : > { %s2125_s26 = scalar_select %p275_p1, %s2020_s19, %s277_s24  }
   0xb   : > { %p2127_p5 = por %p288_p2, %p287_p0  ;;  %p2131_p6 = por %p294_p4, %p293_p3 }
   0xc   : > { %p1559_p7 = scmp.ge.s32.totalorder %s2024_s20, 1  ;;  %p359_p8 = scmp.lt.s32.totalorder %s2024_s20, 3 }
   0xe   : > { %p360_p9 = pnand %p1559_p7, %p359_p8 }
   0xf   : > { %p407_p10 = scmp.lt.s32.totalorder (!%p360_p9), %s2110_s21, 1  ;;  %s2778_s0 = sld [smem:[#allocation5_spill]] (!%p360_p9) }
  0x10   : > { %363 = sbr.rel (%p360_p9) target bundleno = 1142 (0x476), region = 64  ;;  %s1619_s16 = sshll.u32 (!%p360_p9), %s2110_s21, 4 }
  0x15   : > { %v439_v0 = vld [vmem:[%s2766_s3 + $0x8] sm:$0xff]  ;;  %v2026_v1 = vmov 0.0   ;;  %v438_v2 = vld [vmem:[%s2766_s3] sm:$0xff]  ;;  %vm2027_vm0 = vmmov 0   ;;  %s2148_s14 = scalar_select %p407_p10, %s2110_s21, 1  ;;  %vm447_vm1 = vcmask 130048  }
  0x16   : > { %1692 = vmatprep.subr.mxu0 %v2026_v1  ;;  %1696 = vmatprep.mubr.msk.f32.mxu0 %vm2027_vm0, %v2026_v1  ;;  %v686_v6 = vld [vmem:[%s2768_s5 + $0x18] sm:$0xff]  ;;  %v685_v21 = vld [vmem:[%s2768_s5 + $0x10] sm:$0xff]  ;;  %v684_v22 = vld [vmem:[%s2768_s5 + $0x8] sm:$0xff]  ;;  %vm694_vm2 = vcmask 261120   ;;  %vm1057_vm3 = vcmask 523264   ;;  %vm1311_vm4 = vcmask 64512  }
  0x17   : > { %1693 = vmatpush3.msra.mxu0 %v439_v0  ;;  %1884 = vmatprep.subr.mxu1 %v2026_v1  ;;  %s1888_s15 = smul.u32 136, %s2148_s14  ;;  %v683_v23 = vld [vmem:[%s2768_s5] sm:$0xff]  ;;  %vm1462_vm5 = vcmask 57344   ;;  %s2028_s21 = smov [#allocation2]  }
  0x18   : > { %1694 = vmatprep.subr.mxu0 %v2026_v1  ;;  %1886 = vmatpush3.msra.mxu1 %v439_v0  ;;  %v2259_v24 = vld [vmem:[%s2767_s4] ss:$0 sm:$0xff] }
  0x19   : > { %1695 = vmatpush3.msra.mxu0 %v438_v2  ;;  %1885 = vmatprep.subr.mxu1 %v2026_v1  ;;  %s2161_s24 = scalar_lea.vmem %s2778_s0, %s1888_s15  ;;  %s2254_s30 = scalar_lea.vmem %s2764_s1, %s1888_s15 }
  0x1a   : > { %1887 = vmatpush3.msra.mxu1 %v438_v2  ;;  %1726 = vmatprep.mubr.msk.f32.mxu1 %vm2027_vm0, %v2026_v1  ;;  %v421_v3 = vld [vmem:[%s2161_s24] sm:$0xff]  ;;  %v422_v4 = vld [vmem:[%s2161_s24 + $0x8] sm:$0xff]  ;;  %v431_v5 = vld [vmem:[%s2161_s24 + $0x50] sm:$0xff] }
  0x1b   : > { %1747 = vmatprep.subr.mxu1 %v2026_v1  ;;  %1806 = vmatprep.subr.mxu0 %v2026_v1  ;;  %v432_v7 = vld [vmem:[%s2161_s24 + $0x58] sm:$0xff]  ;;  %v423_v8 = vld [vmem:[%s2161_s24 + $0x10] sm:$0xff]  ;;  %v433_v9 = vld [vmem:[%s2161_s24 + $0x60] sm:$0xff] }
  0x1c   : > { %1697 = vmatmul.mubr.msk.f32.vlgmr.msra.gmra.mxu0 %vm447_vm1, %v421_v3  ;;  %1727 = vmatmul.mubr.msk.f32.vlgmr.msra.gmra.mxu1 %vm447_vm1, %v431_v5  ;;  %v424_v10 = vld [vmem:[%s2161_s24 + $0x18] sm:$0xff]  ;;  %v434_v11 = vld [vmem:[%s2161_s24 + $0x68] sm:$0xff]  ;;  %v425_v12 = vld [vmem:[%s2161_s24 + $0x20] sm:$0xff] }
  0x1d   : > { %1699 = vmatprep.mubr.msk.f32.mxu0 %vm2027_vm0, %v2026_v1  ;;  %1729 = vmatprep.mubr.msk.f32.mxu1 %vm2027_vm0, %v2026_v1  ;;  %v435_v13 = vld [vmem:[%s2161_s24 + $0x70] sm:$0xff]  ;;  %v426_v14 = vld [vmem:[%s2161_s24 + $0x28] sm:$0xff]  ;;  %v436_v15 = vld [vmem:[%s2161_s24 + $0x78] sm:$0xff] }
  0x1e   : > { %1748 = vmatpush3.msra.mxu1 %v686_v6  ;;  %v427_v16 = vld [vmem:[%s2161_s24 + $0x30] sm:$0xff]  ;;  %v437_v17 = vld [vmem:[%s2161_s24 + $0x80] sm:$0xff]  ;;  %v428_v18 = vld [vmem:[%s2161_s24 + $0x38] sm:$0xff] }
  0x1f   : > { %1749 = vmatprep.subr.mxu1 %v2026_v1  ;;  %v429_v19 = vld [vmem:[%s2161_s24 + $0x40] sm:$0xff]  ;;  %v430_v20 = vld [vmem:[%s2161_s24 + $0x48] sm:$0xff]  ;;  %v651_v39 = vld [vmem:[%s2254_s30 + $0x10] sm:$0xff] }
  0x20   : > { %1700 = vmatmul.mubr.msk.f32.gmra.mxu0 %vm447_vm1, %v422_v4  ;;  %1730 = vmatmul.mubr.msk.f32.gmra.mxu1 %vm447_vm1, %v432_v7  ;;  %v649_v26 = vld [vmem:[%s2254_s30] sm:$0xff]  ;;  %v650_v32 = vld [vmem:[%s2254_s30 + $0x8] sm:$0xff]  ;;  %v652_v46 = vld [vmem:[%s2254_s30 + $0x18] sm:$0xff] }
  0x21   : > { %1702 = vmatprep.mubr.msk.f32.mxu0 %vm2027_vm0, %v2026_v1  ;;  %1732 = vmatprep.mubr.msk.f32.mxu1 %vm2027_vm0, %v2026_v1  ;;  %v653_v53 = vld [vmem:[%s2254_s30 + $0x20] sm:$0xff]  ;;  %v654_v60 = vld [vmem:[%s2254_s30 + $0x28] sm:$0xff]  ;;  %v655_v4 = vld [vmem:[%s2254_s30 + $0x30] sm:$0xff] }
  0x22   : > { %1750 = vmatpush3.msra.mxu1 %v685_v21 }
  0x23   : > { %1751 = vmatprep.subr.mxu1 %v2026_v1 }
  0x24   : > { %1703 = vmatmul.mubr.msk.f32.gmra.mxu0 %vm447_vm1, %v423_v8  ;;  %1733 = vmatmul.mubr.msk.f32.gmra.mxu1 %vm447_vm1, %v433_v9 }
  0x25   : > { %1705 = vmatprep.mubr.msk.f32.mxu0 %vm2027_vm0, %v2026_v1  ;;  %1735 = vmatprep.mubr.msk.f32.mxu1 %vm2027_vm0, %v2026_v1 }
  0x26   : > { %1752 = vmatpush3.msra.mxu1 %v684_v22 }
  0x27   : > { %1753 = vmatprep.subr.mxu1 %v2026_v1 }
  0x28   : > { %1706 = vmatmul.mubr.msk.f32.gmra.mxu0 %vm447_vm1, %v424_v10  ;;  %1736 = vmatmul.mubr.msk.f32.gmra.mxu1 %vm447_vm1, %v434_v11  ;;  %v665_v10 = vld [vmem:[%s2254_s30 + $0x80] sm:$0xff] }
  0x29   : > { %1708 = vmatprep.mubr.msk.f32.mxu0 %vm2027_vm0, %v2026_v1  ;;  %1738 = vmatprep.mubr.msk.f32.mxu1 %vm2027_vm0, %v2026_v1 }
  0x2a   : > { %1754 = vmatpush3.msra.mxu1 %v683_v23 }
  0x2b   : > { %1314 = vmatprep.subr.mxu1 %v2026_v1 }
  0x2c   : > { %1709 = vmatmul.mubr.msk.f32.gmra.mxu0 %vm447_vm1, %v425_v12  ;;  %1739 = vmatmul.mubr.msk.f32.gmra.mxu1 %vm447_vm1, %v435_v13  ;;  %v656_v12 = vld [vmem:[%s2254_s30 + $0x38] sm:$0xff] }
  0x2d   : > { %1711 = vmatprep.mubr.msk.f32.mxu0 %vm2027_vm0, %v2026_v1  ;;  %1741 = vmatprep.mubr.msk.f32.mxu1 %vm2027_vm0, %v2026_v1 }
  0x30   : > { %1712 = vmatmul.mubr.msk.f32.gmra.mxu0 %vm447_vm1, %v426_v14  ;;  %1742 = vmatmul.mubr.msk.f32.gmra.mxu1 %vm447_vm1, %v436_v15 }
  0x31   : > { %1714 = vmatprep.mubr.msk.f32.mxu0 %vm2027_vm0, %v2026_v1  ;;  %1744 = vmatprep.mubr.msk.f32.mxu1 %vm2027_vm0, %v2026_v1 }
  0x34   : > { %1715 = vmatmul.mubr.msk.f32.gmra.mxu0 %vm447_vm1, %v427_v16  ;;  %1745 = vmatmul.mubr.msk.f32.gmra.mxu1 %vm447_vm1, %v437_v17 }
  0x35   : > { %1717 = vmatprep.mubr.msk.f32.mxu0 %vm2027_vm0, %v2026_v1  ;;  %1755 = vmatprep.mubr.msk.f32.mxu1 %vm2027_vm0, %v2026_v1 }
  0x38   : > { %1718 = vmatmul.mubr.msk.f32.gmra.mxu0 %vm447_vm1, %v428_v18 }
  0x39   : > { %1720 = vmatprep.mubr.msk.f32.mxu0 %vm2027_vm0, %v2026_v1 }
  0x3c   : > { %1721 = vmatmul.mubr.msk.f32.gmra.mxu0 %vm447_vm1, %v429_v19 }
  0x3d   : > { %1723 = vmatprep.mubr.msk.f32.mxu0 %vm2027_vm0, %v2026_v1 }
  0x40   : > { %1724 = vmatmul.mubr.msk.f32.gmra.mxu0 %vm447_vm1, %v430_v20  ;;  %v657_v20 = vld [vmem:[%s2254_s30 + $0x40] sm:$0xff] }
  0x41   : > { %1822 = vmatprep.mubr.msk.f32.mxu0 %vm2027_vm0, %v2026_v1 }
  0xdc   : > { %v565_v25 = vpop.f32.mrf.mxu0  ;;  %v2265_v30 = vpop.f32.mrf.mxu1 }
  0xdd   : > { %v566_v27 = vadd.f32 %v2259_v24, %v565_v25 }
  0xde   : > { %v1698_v28 = vpop.f32.mrf.mxu0  ;;  %v1728_v34 = vpop.f32.mrf.mxu1 }
  0xdf   : > { %v2263_v29 = vadd.f32 %v649_v26, %v566_v27  ;;  %v658_v26 = vld [vmem:[%s2254_s30 + $0x48] sm:$0xff]  ;;  %v616_v28 = vadd.f32 %v2259_v24, %v2265_v30 }
  0xe0   : > { %v570_v31 = vpop.f32.mrf.mxu0  ;;  %v2275_v37 = vpop.f32.mrf.mxu1 }
  0xe1   : > { %v571_v33 = vadd.f32 %v2259_v24, %v570_v31  ;;  %1756 = vmatmul.mubr.msk.f32.vlgmr.msra.gmra.mxu1 %vm694_vm2, %v2263_v29 }
  0xe2   : > { %v1701_v35 = vpop.f32.mrf.mxu0  ;;  %1758 = vmatprep.mubr.msk.f32.mxu1 %vm2027_vm0, %v2026_v1  ;;  %v1731_v41 = vpop.f32.mrf.mxu1 }
  0xe3   : > { %v2273_v36 = vadd.f32 %v650_v32, %v571_v33  ;;  %v659_v32 = vld [vmem:[%s2254_s30 + $0x50] sm:$0xff]  ;;  %v621_v35 = vadd.f32 %v2259_v24, %v2275_v37 }
  0xe4   : > { %v575_v38 = vpop.f32.mrf.mxu0  ;;  %v2285_v44 = vpop.f32.mrf.mxu1  ;;  %v2354_v34 = vadd.f32 %v659_v32, %v616_v28 }
  0xe5   : > { %v576_v40 = vadd.f32 %v2259_v24, %v575_v38  ;;  %1759 = vmatmul.mubr.msk.f32.gmra.mxu1 %vm694_vm2, %v2273_v36  ;;  %v660_v38 = vld [vmem:[%s2254_s30 + $0x58] sm:$0xff] }
  0xe6   : > { %v1704_v42 = vpop.f32.mrf.mxu0  ;;  %1761 = vmatprep.mubr.msk.f32.mxu1 %vm2027_vm0, %v2026_v1  ;;  %v1734_v48 = vpop.f32.mrf.mxu1  ;;  %v2363_v30 = vadd.f32 %v660_v38, %v621_v35 }
  0xe7   : > { %v2283_v43 = vadd.f32 %v651_v39, %v576_v40  ;;  %v626_v39 = vadd.f32 %v2259_v24, %v2285_v44  ;;  %v661_v40 = vld [vmem:[%s2254_s30 + $0x60] sm:$0xff]  ;;  %v662_v42 = vld [vmem:[%s2254_s30 + $0x68] sm:$0xff] }
  0xe8   : > { %v580_v45 = vpop.f32.mrf.mxu0  ;;  %v2295_v51 = vpop.f32.mrf.mxu1 }
  0xe9   : > { %v581_v47 = vadd.f32 %v2259_v24, %v580_v45  ;;  %1762 = vmatmul.mubr.msk.f32.gmra.mxu1 %vm694_vm2, %v2283_v43  ;;  %v2372_v41 = vadd.f32 %v661_v40, %v626_v39  ;;  %v631_v37 = vadd.f32 %v2259_v24, %v2295_v51 }
  0xea   : > { %v1707_v49 = vpop.f32.mrf.mxu0  ;;  %1764 = vmatprep.mubr.msk.f32.mxu1 %vm2027_vm0, %v2026_v1  ;;  %v1737_v55 = vpop.f32.mrf.mxu1 }
  0xeb   : > { %v2293_v50 = vadd.f32 %v652_v46, %v581_v47  ;;  %v2381_v45 = vadd.f32 %v662_v42, %v631_v37  ;;  %v663_v46 = vld [vmem:[%s2254_s30 + $0x70] sm:$0xff]  ;;  %v664_v49 = vld [vmem:[%s2254_s30 + $0x78] sm:$0xff]  ;;  %s1562_s30 = sshll.u32 %s2148_s14, 1  ;;  %s1968_s14 = sshll.u32 %s2028_s21, 4  ;;  %s1969_s14 = int_to_ptr.vmem [resolvable:$false] %s1968_s14 }
  0xec   : > { %v585_v52 = vpop.f32.mrf.mxu0  ;;  %v2305_v58 = vpop.f32.mrf.mxu1  ;;  %v1052_v55 = vld [vmem:[%s2770_s7 + $0x18] sm:$0xff]  ;;  %s420_s15 = scalar_lea.vmem %s2765_s2, %s1562_s30  ;;  %s2728_s30 = scalar_lea.hbm %s2774_s11, %s1619_s16 }
  0xed   : > { %v586_v54 = vadd.f32 %v2259_v24, %v585_v52  ;;  %1765 = vmatmul.mubr.msk.f32.gmra.mxu1 %vm694_vm2, %v2293_v50  ;;  %v636_v44 = vadd.f32 %v2259_v24, %v2305_v58  ;;  %v1055_v52 = vld [vmem:[%s2770_s7 + $0x30] sm:$0xff]  ;;  %v1050_v58 = vld [vmem:[%s2770_s7 + $0x8] sm:$0xff]  ;;  %s1970_s13 = scalar_lea.vmem %s1969_s14, 32 }
  0xee   : > { %v1710_v56 = vpop.f32.mrf.mxu0  ;;  %1767 = vmatprep.mubr.msk.f32.mxu1 %vm2027_vm0, %v2026_v1  ;;  %v1740_v62 = vpop.f32.mrf.mxu1 }
  0xef   : > { %v2303_v57 = vadd.f32 %v653_v53, %v586_v54  ;;  %v2390_v47 = vadd.f32 %v663_v46, %v636_v44  ;;  %v1054_v53 = vld [vmem:[%s2770_s7 + $0x28] sm:$0xff]  ;;  %v1053_v54 = vld [vmem:[%s2770_s7 + $0x20] sm:$0xff]  ;;  %v1051_v56 = vld [vmem:[%s2770_s7 + $0x10] sm:$0xff] }
  0xf0   : > { %v590_v59 = vpop.f32.mrf.mxu0  ;;  %v640_v2 = vpop.f32.mrf.mxu1 }
  0xf1   : > { %v591_v61 = vadd.f32 %v2259_v24, %v590_v59  ;;  %1768 = vmatmul.mubr.msk.f32.gmra.mxu1 %vm694_vm2, %v2303_v57  ;;  %v641_v48 = vadd.f32 %v2259_v24, %v640_v2  ;;  %v1049_v59 = vld [vmem:[%s2770_s7] sm:$0xff] }
  0xf2   : > { %v1713_v63 = vpop.f32.mrf.mxu0  ;;  %1770 = vmatprep.mubr.msk.f32.mxu1 %vm2027_vm0, %v2026_v1  ;;  %v1743_v6 = vpop.f32.mrf.mxu1 }
  0xf3   : > { %v2313_v0 = vadd.f32 %v654_v60, %v591_v61  ;;  %v2398_v51 = vadd.f32 %v664_v49, %v641_v48  ;;  %v2444_v60 = vld [vmem:[%s2769_s6] ss:$0 sm:$0xff] }
  0xf4   : > { %v595_v3 = vpop.f32.mrf.mxu0  ;;  %v645_v9 = vpop.f32.mrf.mxu1 }
  0xf5   : > { %v596_v5 = vadd.f32 %v2259_v24, %v595_v3  ;;  %1771 = vmatmul.mubr.msk.f32.gmra.mxu1 %vm694_vm2, %v2313_v0  ;;  %v646_v13 = vadd.f32 %v2259_v24, %v645_v9 }
  0xf6   : > { %v1716_v7 = vpop.f32.mrf.mxu0  ;;  %1773 = vmatprep.mubr.msk.f32.mxu1 %vm2027_vm0, %v2026_v1  ;;  %v1746_v15 = vpop.f32.mrf.mxu1 }
  0xf7   : > { %v2321_v8 = vadd.f32 %v655_v4, %v596_v5  ;;  %v2331_v17 = vadd.f32 %v665_v10, %v646_v13 }
  0xf8   : > { %v600_v11 = vpop.f32.mrf.mxu0 }
  0xf9   : > { %v601_v14 = vadd.f32 %v2259_v24, %v600_v11  ;;  %1774 = vmatmul.mubr.msk.f32.gmra.mxu1 %vm694_vm2, %v2321_v8 }
  0xfa   : > { %v1719_v16 = vpop.f32.mrf.mxu0  ;;  %1776 = vmatprep.mubr.msk.f32.mxu1 %vm2027_vm0, %v2026_v1 }
  0xfb   : > { %v2333_v18 = vadd.f32 %v656_v12, %v601_v14 }
  0xfc   : > { %v605_v19 = vpop.f32.mrf.mxu0 }
  0xfd   : > { %v606_v21 = vadd.f32 %v2259_v24, %v605_v19  ;;  %1777 = vmatmul.mubr.msk.f32.gmra.mxu1 %vm694_vm2, %v2333_v18 }
  0xfe   : > { %v1722_v22 = vpop.f32.mrf.mxu0  ;;  %1779 = vmatprep.mubr.msk.f32.mxu1 %vm2027_vm0, %v2026_v1 }
  0xff   : > { %v2341_v23 = vadd.f32 %v657_v20, %v606_v21 }
 0x100   : > { %v610_v25 = vpop.f32.mrf.mxu0 }
 0x101   : > { %v611_v27 = vadd.f32 %v2259_v24, %v610_v25  ;;  %1780 = vmatmul.mubr.msk.f32.gmra.mxu1 %vm694_vm2, %v2341_v23  ;;  %v1056_v24 = vld [vmem:[%s2770_s7 + $0x38] sm:$0xff] }
 0x102   : > { %v1725_v31 = vpop.f32.mrf.mxu0  ;;  %1782 = vmatprep.mubr.msk.f32.mxu1 %vm2027_vm0, %v2026_v1  ;;  %1807 = vmatpush3.msra.mxu0 %v1056_v24 }
 0x103   : > { %v2352_v33 = vadd.f32 %v658_v26, %v611_v27  ;;  %1808 = vmatprep.subr.mxu0 %v2026_v1 }
 0x104   : > { %1809 = vmatpush3.msra.mxu0 %v1055_v52 }
 0x105   : > { %1783 = vmatmul.mubr.msk.f32.gmra.mxu1 %vm694_vm2, %v2352_v33  ;;  %1810 = vmatprep.subr.mxu0 %v2026_v1 }
 0x106   : > { %1785 = vmatprep.mubr.msk.f32.mxu1 %vm2027_vm0, %v2026_v1  ;;  %1811 = vmatpush3.msra.mxu0 %v1054_v53 }
 0x107   : > { %1812 = vmatprep.subr.mxu0 %v2026_v1 }
 0x108   : > { %1813 = vmatpush3.msra.mxu0 %v1053_v54 }
 0x109   : > { %1786 = vmatmul.mubr.msk.f32.gmra.mxu1 %vm694_vm2, %v2354_v34  ;;  %1814 = vmatprep.subr.mxu0 %v2026_v1 }
 0x10a   : > { %1788 = vmatprep.mubr.msk.f32.mxu1 %vm2027_vm0, %v2026_v1  ;;  %1815 = vmatpush3.msra.mxu0 %v1052_v55 }
 0x10b   : > { %1816 = vmatprep.subr.mxu0 %v2026_v1 }
 0x10c   : > { %1817 = vmatpush3.msra.mxu0 %v1051_v56 }
 0x10d   : > { %1789 = vmatmul.mubr.msk.f32.gmra.mxu1 %vm694_vm2, %v2363_v30  ;;  %1818 = vmatprep.subr.mxu0 %v2026_v1 }
 0x10e   : > { %1791 = vmatprep.mubr.msk.f32.mxu1 %vm2027_vm0, %v2026_v1  ;;  %1819 = vmatpush3.msra.mxu0 %v1050_v58 }
 0x10f   : > { %1820 = vmatprep.subr.mxu0 %v2026_v1 }
 0x110   : > { %1821 = vmatpush3.msra.mxu0 %v1049_v59 }
 0x111   : > { %1792 = vmatmul.mubr.msk.f32.gmra.mxu1 %vm694_vm2, %v2372_v41 }
 0x112   : > { %1794 = vmatprep.mubr.msk.f32.mxu1 %vm2027_vm0, %v2026_v1 }
 0x115   : > { %1795 = vmatmul.mubr.msk.f32.gmra.mxu1 %vm694_vm2, %v2381_v45 }
 0x116   : > { %1797 = vmatprep.mubr.msk.f32.mxu1 %vm2027_vm0, %v2026_v1 }
 0x119   : > { %1798 = vmatmul.mubr.msk.f32.gmra.mxu1 %vm694_vm2, %v2390_v47 }
 0x11a   : > { %1800 = vmatprep.mubr.msk.f32.mxu1 %vm2027_vm0, %v2026_v1 }
 0x11d   : > { %1801 = vmatmul.mubr.msk.f32.gmra.mxu1 %vm694_vm2, %v2398_v51 }
 0x11e   : > { %1803 = vmatprep.mubr.msk.f32.mxu1 %vm2027_vm0, %v2026_v1 }
 0x121   : > { %1804 = vmatmul.mubr.msk.f32.gmra.mxu1 %vm694_vm2, %v2331_v17 }
 0x1a1   : > { %v812_v61 = vpop.f32.mrf.mxu1 }
 0x1a2   : > { %v2447_v62 = vadd.f32 %v2444_v60, %v812_v61 }
 0x1a3   : > { %v1757_v63 = vpop.f32.mrf.mxu1 }
 0x1a4   : > { %v896_v2 = vmul.f32 %v2447_v62, %v2447_v62 }
 0x1a5   : > { %v817_v3 = vpop.f32.mrf.mxu1 }
 0x1a6   : > { %v913_v4 = vmul.f32 %v896_v2, %v2447_v62  ;;  %v2453_v5 = vadd.f32 %v2444_v60, %v817_v3 }
 0x1a7   : > { %v1760_v6 = vpop.f32.mrf.mxu1 }
 0x1a8   : > { %v930_v7 = vmul.f32 0.044715, %v913_v4  ;;  %v897_v9 = vmul.f32 %v2453_v5, %v2453_v5 }
 0x1a9   : > { %v822_v10 = vpop.f32.mrf.mxu1 }
 0x1aa   : > { %v947_v11 = vadd.f32 %v930_v7, %v2447_v62  ;;  %v914_v12 = vmul.f32 %v897_v9, %v2453_v5  ;;  %v2460_v13 = vadd.f32 %v2444_v60, %v822_v10 }
 0x1ab   : > { %v1763_v14 = vpop.f32.mrf.mxu1 }
 0x1ac   : > { %v964_v15 = vmul.f32 0.7978846, %v947_v11  ;;  %v931_v16 = vmul.f32 0.044715, %v914_v12  ;;  %v898_v19 = vmul.f32 %v2460_v13, %v2460_v13 }
 0x1ad   : > { %v827_v20 = vpop.f32.mrf.mxu1 }
 0x1ae   : > { %1930 = vtanh.f32 %v964_v15  ;;  %v948_v21 = vadd.f32 %v931_v16, %v2453_v5  ;;  %v915_v22 = vmul.f32 %v898_v19, %v2460_v13  ;;  %v2467_v25 = vadd.f32 %v2444_v60, %v827_v20 }
 0x1af   : > { %v1766_v26 = vpop.f32.mrf.mxu1 }
 0x1b0   : > { %v965_v27 = vmul.f32 0.7978846, %v948_v21  ;;  %v932_v28 = vmul.f32 0.044715, %v915_v22  ;;  %v899_v31 = vmul.f32 %v2467_v25, %v2467_v25 }
 0x1b1   : > { %v832_v32 = vpop.f32.mrf.mxu1 }
 0x1b2   : > { %1932 = vtanh.f32 %v965_v27  ;;  %v949_v35 = vadd.f32 %v932_v28, %v2460_v13  ;;  %v916_v38 = vmul.f32 %v899_v31, %v2467_v25  ;;  %v2474_v39 = vadd.f32 %v2444_v60, %v832_v32 }
 0x1b3   : > { %v1769_v40 = vpop.f32.mrf.mxu1 }
 0x1b4   : > { %v966_v37 = vmul.f32 0.7978846, %v949_v35  ;;  %v933_v42 = vmul.f32 0.044715, %v916_v38  ;;  %v900_v44 = vmul.f32 %v2474_v39, %v2474_v39 }
 0x1b5   : > { %v837_v46 = vpop.f32.mrf.mxu1 }
 0x1b6   : > { %1934 = vtanh.f32 %v966_v37  ;;  %v950_v48 = vadd.f32 %v933_v42, %v2467_v25  ;;  %v917_v49 = vmul.f32 %v900_v44, %v2474_v39  ;;  %v2481_v24 = vadd.f32 %v2444_v60, %v837_v46 }
 0x1b7   : > { %v1772_v52 = vpop.f32.mrf.mxu1 }
 0x1b8   : > { %v967_v53 = vmul.f32 0.7978846, %v950_v48  ;;  %v934_v54 = vmul.f32 0.044715, %v917_v49  ;;  %v901_v55 = vmul.f32 %v2481_v24, %v2481_v24 }
 0x1b9   : > { %v842_v56 = vpop.f32.mrf.mxu1 }
 0x1ba   : > { %1936 = vtanh.f32 %v967_v53  ;;  %v951_v58 = vadd.f32 %v934_v54, %v2474_v39  ;;  %v918_v59 = vmul.f32 %v901_v55, %v2481_v24  ;;  %v2488_v61 = vadd.f32 %v2444_v60, %v842_v56 }
 0x1bb   : > { %v1931_v63 = vpop.eup %1930  ;;  %v1775_v2 = vpop.f32.mrf.mxu1 }
 0x1bc   : > { %v998_v3 = vadd.f32 1.0, %v1931_v63  ;;  %v968_v4 = vmul.f32 0.7978846, %v951_v58  ;;  %v935_v6 = vmul.f32 0.044715, %v918_v59  ;;  %v902_v7 = vmul.f32 %v2488_v61, %v2488_v61 }
 0x1bd   : > { %v847_v9 = vpop.f32.mrf.mxu1 }
 0x1be   : > { %v1015_v10 = vmul.f32 0.5, %v998_v3  ;;  %1938 = vtanh.f32 %v968_v4  ;;  %v952_v11 = vadd.f32 %v935_v6, %v2481_v24  ;;  %v919_v12 = vmul.f32 %v902_v7, %v2488_v61 }
 0x1bf   : > { %v1933_v14 = vpop.eup %1932  ;;  %v2495_v15 = vadd.f32 %v2444_v60, %v847_v9  ;;  %v1778_v16 = vpop.f32.mrf.mxu1 }
 0x1c0   : > { %v1032_v19 = vmul.f32 %v1015_v10, %v2447_v62  ;;  %v969_v20 = vmul.f32 0.7978846, %v952_v11  ;;  %v936_v21 = vmul.f32 0.044715, %v919_v12  ;;  %v999_v22 = vadd.f32 1.0, %v1933_v14 }
 0x1c1   : > { %v903_v26 = vmul.f32 %v2495_v15, %v2495_v15  ;;  %v852_v27 = vpop.f32.mrf.mxu1 }
 0x1c2   : > { %1940 = vtanh.f32 %v969_v20  ;;  %v953_v28 = vadd.f32 %v936_v21, %v2488_v61  ;;  %v2502_v31 = vadd.f32 %v2444_v60, %v852_v27  ;;  %1823 = vmatmul.mubr.msk.f32.vlgmr.msra.gmra.mxu0 %vm1057_vm3, %v1032_v19  ;;  %v1016_v32 = vmul.f32 0.5, %v999_v22 }
 0x1c3   : > { %v1935_v35 = vpop.eup %1934  ;;  %v920_v38 = vmul.f32 %v903_v26, %v2495_v15  ;;  %v1781_v62 = vpop.f32.mrf.mxu1  ;;  %1825 = vmatprep.mubr.msk.f32.mxu0 %vm2027_vm0, %v2026_v1 }
 0x1c4   : > { %v970_v40 = vmul.f32 0.7978846, %v953_v28  ;;  %v904_v37 = vmul.f32 %v2502_v31, %v2502_v31  ;;  %v1033_v42 = vmul.f32 %v1016_v32, %v2453_v5  ;;  %v1000_v44 = vadd.f32 1.0, %v1935_v35 }
 0x1c5   : > { %v937_v46 = vmul.f32 0.044715, %v920_v38  ;;  %v857_v48 = vpop.f32.mrf.mxu1 }
 0x1c6   : > { %1942 = vtanh.f32 %v970_v40  ;;  %v921_v49 = vmul.f32 %v904_v37, %v2502_v31  ;;  %v2513_v52 = vadd.f32 %v2444_v60, %v857_v48  ;;  %1826 = vmatmul.mubr.msk.f32.gmra.mxu0 %vm1057_vm3, %v1033_v42  ;;  %v1017_v53 = vmul.f32 0.5, %v1000_v44 }
 0x1c7   : > { %v1937_v54 = vpop.eup %1936  ;;  %v954_v55 = vadd.f32 %v937_v46, %v2495_v15  ;;  %v1784_v56 = vpop.f32.mrf.mxu1  ;;  %1828 = vmatprep.mubr.msk.f32.mxu0 %vm2027_vm0, %v2026_v1 }
 0x1c8   : > { %v938_v5 = vmul.f32 0.044715, %v921_v49  ;;  %v905_v58 = vmul.f32 %v2513_v52, %v2513_v52  ;;  %v1034_v59 = vmul.f32 %v1017_v53, %v2460_v13  ;;  %v1001_v63 = vadd.f32 1.0, %v1937_v54 }
 0x1c9   : > { %v971_v2 = vmul.f32 0.7978846, %v954_v55  ;;  %v862_v3 = vpop.f32.mrf.mxu1 }
 0x1ca   : > { %v955_v4 = vadd.f32 %v938_v5, %v2502_v31  ;;  %v922_v6 = vmul.f32 %v905_v58, %v2513_v52  ;;  %v2525_v7 = vadd.f32 %v2444_v60, %v862_v3  ;;  %1829 = vmatmul.mubr.msk.f32.gmra.mxu0 %vm1057_vm3, %v1034_v59  ;;  %v1018_v9 = vmul.f32 0.5, %v1001_v63 }
 0x1cb   : > { %v1939_v10 = vpop.eup %1938  ;;  %1944 = vtanh.f32 %v971_v2  ;;  %v1787_v11 = vpop.f32.mrf.mxu1  ;;  %1831 = vmatprep.mubr.msk.f32.mxu0 %vm2027_vm0, %v2026_v1 }
 0x1cc   : > { %v972_v13 = vmul.f32 0.7978846, %v955_v4  ;;  %v939_v12 = vmul.f32 0.044715, %v922_v6  ;;  %v906_v14 = vmul.f32 %v2525_v7, %v2525_v7  ;;  %v1035_v16 = vmul.f32 %v1018_v9, %v2467_v25 }
 0x1cd   : > { %v867_v19 = vpop.f32.mrf.mxu1  ;;  %v1002_v20 = vadd.f32 1.0, %v1939_v10 }
 0x1ce   : > { %1946 = vtanh.f32 %v972_v13  ;;  %v956_v21 = vadd.f32 %v939_v12, %v2513_v52  ;;  %v923_v22 = vmul.f32 %v906_v14, %v2525_v7  ;;  %v2536_v26 = vadd.f32 %v2444_v60, %v867_v19  ;;  %1832 = vmatmul.mubr.msk.f32.gmra.mxu0 %vm1057_vm3, %v1035_v16 }
 0x1cf   : > { %v1941_v27 = vpop.eup %1940  ;;  %v1790_v28 = vpop.f32.mrf.mxu1  ;;  %1834 = vmatprep.mubr.msk.f32.mxu0 %vm2027_vm0, %v2026_v1  ;;  %v1019_v32 = vmul.f32 0.5, %v1002_v20 }
 0x1d0   : > { %v973_v35 = vmul.f32 0.7978846, %v956_v21  ;;  %v940_v25 = vmul.f32 0.044715, %v923_v22  ;;  %v907_v38 = vmul.f32 %v2536_v26, %v2536_v26  ;;  %v1003_v62 = vadd.f32 1.0, %v1941_v27 }
 0x1d1   : > { %v872_v40 = vpop.f32.mrf.mxu1  ;;  %v1036_v37 = vmul.f32 %v1019_v32, %v2474_v39 }
 0x1d2   : > { %1948 = vtanh.f32 %v973_v35  ;;  %v957_v42 = vadd.f32 %v940_v25, %v2525_v7  ;;  %v924_v44 = vmul.f32 %v907_v38, %v2536_v26  ;;  %v2547_v46 = vadd.f32 %v2444_v60, %v872_v40 }
 0x1d3   : > { %v1943_v48 = vpop.eup %1942  ;;  %1835 = vmatmul.mubr.msk.f32.gmra.mxu0 %vm1057_vm3, %v1036_v37  ;;  %v1793_v49 = vpop.f32.mrf.mxu1  ;;  %v1020_v53 = vmul.f32 0.5, %v1003_v62 }
 0x1d4   : > { %v974_v54 = vmul.f32 0.7978846, %v957_v42  ;;  %v941_v55 = vmul.f32 0.044715, %v924_v44  ;;  %v908_v56 = vmul.f32 %v2547_v46, %v2547_v46  ;;  %1837 = vmatprep.mubr.msk.f32.mxu0 %vm2027_vm0, %v2026_v1  ;;  %v1004_v39 = vadd.f32 1.0, %v1943_v48 }
 0x1d5   : > { %v877_v5 = vpop.f32.mrf.mxu1  ;;  %v1037_v58 = vmul.f32 %v1020_v53, %v2481_v24 }
 0x1d6   : > { %1950 = vtanh.f32 %v974_v54  ;;  %v958_v59 = vadd.f32 %v941_v55, %v2536_v26  ;;  %v925_v63 = vmul.f32 %v908_v56, %v2547_v46  ;;  %v2558_v2 = vadd.f32 %v2444_v60, %v877_v5 }
 0x1d7   : > { %1838 = vmatmul.mubr.msk.f32.gmra.mxu0 %vm1057_vm3, %v1037_v58  ;;  %v1796_v3 = vpop.f32.mrf.mxu1  ;;  %v1021_v4 = vmul.f32 0.5, %v1004_v39 }
 0x1d8   : > { %v1945_v6 = vpop.eup %1944  ;;  %v975_v9 = vmul.f32 0.7978846, %v958_v59  ;;  %v942_v10 = vmul.f32 0.044715, %v925_v63  ;;  %v909_v11 = vmul.f32 %v2558_v2, %v2558_v2  ;;  %1840 = vmatprep.mubr.msk.f32.mxu0 %vm2027_vm0, %v2026_v1 }
 0x1d9   : > { %v882_v24 = vpop.f32.mrf.mxu1  ;;  %v1038_v13 = vmul.f32 %v1021_v4, %v2488_v61  ;;  %v1005_v12 = vadd.f32 1.0, %v1945_v6 }
 0x1da   : > { %1952 = vtanh.f32 %v975_v9  ;;  %v959_v14 = vadd.f32 %v942_v10, %v2547_v46  ;;  %v926_v16 = vmul.f32 %v909_v11, %v2558_v2  ;;  %v2569_v19 = vadd.f32 %v2444_v60, %v882_v24 }
 0x1db   : > { %v1947_v20 = vpop.eup %1946  ;;  %1841 = vmatmul.mubr.msk.f32.gmra.mxu0 %vm1057_vm3, %v1038_v13  ;;  %v1799_v21 = vpop.f32.mrf.mxu1  ;;  %v1022_v22 = vmul.f32 0.5, %v1005_v12 }
 0x1dc   : > { %v976_v27 = vmul.f32 0.7978846, %v959_v14  ;;  %v943_v28 = vmul.f32 0.044715, %v926_v16  ;;  %v910_v32 = vmul.f32 %v2569_v19, %v2569_v19  ;;  %1843 = vmatprep.mubr.msk.f32.mxu0 %vm2027_vm0, %v2026_v1  ;;  %v1006_v61 = vadd.f32 1.0, %v1947_v20 }
 0x1dd   : > { %v887_v35 = vpop.f32.mrf.mxu1  ;;  %v1039_v25 = vmul.f32 %v1022_v22, %v2495_v15 }
 0x1de   : > { %1954 = vtanh.f32 %v976_v27  ;;  %v960_v38 = vadd.f32 %v943_v28, %v2558_v2  ;;  %v927_v62 = vmul.f32 %v910_v32, %v2569_v19  ;;  %v2580_v40 = vadd.f32 %v2444_v60, %v887_v35 }
 0x1df   : > { %v1949_v37 = vpop.eup %1948  ;;  %1844 = vmatmul.mubr.msk.f32.gmra.mxu0 %vm1057_vm3, %v1039_v25  ;;  %v1802_v42 = vpop.f32.mrf.mxu1  ;;  %v1023_v44 = vmul.f32 0.5, %v1006_v61 }
 0x1e0   : > { %v977_v48 = vmul.f32 0.7978846, %v960_v38  ;;  %v944_v49 = vmul.f32 0.044715, %v927_v62  ;;  %v911_v53 = vmul.f32 %v2580_v40, %v2580_v40  ;;  %1846 = vmatprep.mubr.msk.f32.mxu0 %vm2027_vm0, %v2026_v1  ;;  %v1007_v15 = vadd.f32 1.0, %v1949_v37 }
 0x1e1   : > { %v892_v54 = vpop.f32.mrf.mxu1  ;;  %v1040_v55 = vmul.f32 %v1023_v44, %v2502_v31 }
 0x1e2   : > { %1956 = vtanh.f32 %v977_v48  ;;  %v961_v56 = vadd.f32 %v944_v49, %v2569_v19  ;;  %v928_v39 = vmul.f32 %v911_v53, %v2580_v40  ;;  %v893_v5 = vadd.f32 %v2444_v60, %v892_v54 }
 0x1e3   : > { %v1951_v58 = vpop.eup %1950  ;;  %1847 = vmatmul.mubr.msk.f32.gmra.mxu0 %vm1057_vm3, %v1040_v55  ;;  %v1024_v59 = vmul.f32 0.5, %v1007_v15  ;;  %v1805_v63 = vpop.f32.mrf.mxu1 }
 0x1e4   : > { %v978_v3 = vmul.f32 0.7978846, %v961_v56  ;;  %v945_v4 = vmul.f32 0.044715, %v928_v39  ;;  %v912_v6 = vmul.f32 %v893_v5, %v893_v5  ;;  %1849 = vmatprep.mubr.msk.f32.mxu0 %vm2027_vm0, %v2026_v1  ;;  %v1008_v9 = vadd.f32 1.0, %v1951_v58 }
 0x1e5   : > { %v1041_v31 = vmul.f32 %v1024_v59, %v2513_v52  ;;  %v1300_v39 = vld [vmem:[%s420_s15] sm:$0x3]  ;;  %s405_s15 = sand.u32 1, %s2016_s18  }
 0x1e6   : > { %1958 = vtanh.f32 %v978_v3  ;;  %v962_v10 = vadd.f32 %v945_v4, %v2580_v40  ;;  %v929_v11 = vmul.f32 %v912_v6, %v893_v5  ;;  %v1025_v24 = vmul.f32 0.5, %v1008_v9  ;;  %s406_s22 = scalar_lea.vmem [#allocation2], %s405_s15  ;;  %s1465_s12 = scalar_lea.sflag [#allocation3], %s405_s15 }
 0x1e7   : > { %v1953_v60 = vpop.eup %1952  ;;  %1850 = vmatmul.mubr.msk.f32.gmra.mxu0 %vm1057_vm3, %v1041_v31  ;;  %s1477_s24 = sshll.u32 %s406_s22, 4  ;;  %s1478_s24 = int_to_ptr.vmem [resolvable:$true] %s1477_s24 }
 0x1e8   : > { %v979_v13 = vmul.f32 0.7978846, %v962_v10  ;;  %v946_v12 = vmul.f32 0.044715, %v929_v11  ;;  %1852 = vmatprep.mubr.msk.f32.mxu0 %vm2027_vm0, %v2026_v1  ;;  %v1042_v14 = vmul.f32 %v1025_v24, %v2525_v7  ;;  %v1009_v16 = vadd.f32 1.0, %v1953_v60  ;;  %s1964_s0 = scalar_lea.vmem %s1478_s24, 16  ;;  %p1971_p0 = scmp.lt.s32.totalorder %s1478_s24, %s1969_s14 }
 0x1e9   : > { %p1965_p11 = scmp.ne.s32.totalorder %s1478_s24, %s1964_s0  ;;  %p1972_p1 = scmp.lt.s32.totalorder %s1970_s13, %s1964_s0 }
 0x1ea   : > { %1960 = vtanh.f32 %v979_v13  ;;  %v963_v20 = vadd.f32 %v946_v12, %v893_v5  ;;  %v1026_v21 = vmul.f32 0.5, %v1009_v16 }
 0x1eb   : > { %v1955_v52 = vpop.eup %1954  ;;  %1853 = vmatmul.mubr.msk.f32.gmra.mxu0 %vm1057_vm3, %v1042_v14  ;;  %p1966_p12 = pnand %p1965_p11, %p2127_p5  ;;  %p1973_p2 = por %p1972_p1, %p1971_p0 }
 0x1ec   : > { %v980_v22 = vmul.f32 0.7978846, %v963_v20  ;;  %1855 = vmatprep.mubr.msk.f32.mxu0 %vm2027_vm0, %v2026_v1  ;;  %v1043_v27 = vmul.f32 %v1026_v21, %v2536_v26  ;;  %v1010_v28 = vadd.f32 1.0, %v1955_v52 }
 0x1ed   : > { %p1967_p13 = pneg %p1966_p12 }
 0x1ee   : > { %1962 = vtanh.f32 %v980_v22  ;;  %v1027_v32 = vmul.f32 0.5, %v1010_v28 }
 0x1ef   : > { %v1957_v61 = vpop.eup %1956  ;;  %1856 = vmatmul.mubr.msk.f32.gmra.mxu0 %vm1057_vm3, %v1043_v27  ;;  %p1974_p3 = pnand %p1973_p2, %p1967_p13 }
 0x1f0   : > { %1858 = vmatprep.mubr.msk.f32.mxu0 %vm2027_vm0, %v2026_v1  ;;  %v1044_v7 = vmul.f32 %v1027_v32, %v2547_v46  ;;  %v1011_v35 = vadd.f32 1.0, %v1957_v61 }
 0x1f2   : > { %v1028_v25 = vmul.f32 0.5, %v1011_v35 }
 0x1f3   : > { %v1959_v38 = vpop.eup %1958  ;;  %1859 = vmatmul.mubr.msk.f32.gmra.mxu0 %vm1057_vm3, %v1044_v7 }
 0x1f4   : > { %1861 = vmatprep.mubr.msk.f32.mxu0 %vm2027_vm0, %v2026_v1  ;;  %v1045_v26 = vmul.f32 %v1028_v25, %v2558_v2  ;;  %v1012_v62 = vadd.f32 1.0, %v1959_v38 }
 0x1f6   : > { %v1029_v37 = vmul.f32 0.5, %v1012_v62 }
 0x1f7   : > { %v1961_v42 = vpop.eup %1960  ;;  %1862 = vmatmul.mubr.msk.f32.gmra.mxu0 %vm1057_vm3, %v1045_v26 }
 0x1f8   : > { %1864 = vmatprep.mubr.msk.f32.mxu0 %vm2027_vm0, %v2026_v1  ;;  %v1046_v46 = vmul.f32 %v1029_v37, %v2569_v19  ;;  %v1013_v44 = vadd.f32 1.0, %v1961_v42  ;;  %v1302_v19 = vlaneseq }
 0x1fa   : > { %v1030_v48 = vmul.f32 0.5, %v1013_v44  ;;  %v1303_v55 = vshrl.u32 %v1302_v19, 7 }
 0x1fb   : > { %v1963_v49 = vpop.eup %1962  ;;  %1865 = vmatmul.mubr.msk.f32.gmra.mxu0 %vm1057_vm3, %v1046_v46 }
 0x1fc   : > { %1867 = vmatprep.mubr.msk.f32.mxu0 %vm2027_vm0, %v2026_v1  ;;  %v1047_v2 = vmul.f32 %v1030_v48, %v2580_v40  ;;  %v1014_v53 = vadd.f32 1.0, %v1963_v49  ;;  %v1308_v56 = vsub.s32 1, %v1303_v55  ;;  %v1304_v40 = vsub.s32 0, %v1303_v55  ;;  %v2645_v48 = vld [vmem:[%s2771_s8] ss:$0 sm:$0xff] }
 0x1fe   : > { %v1031_v15 = vmul.f32 0.5, %v1014_v53  ;;  %v1309_v58 = vrot.slane %v1300_v39, %v1308_v56  ;;  %v2628_v59 = vrot.slane %v1300_v39, %v1304_v40 }
 0x1ff   : > { %1868 = vmatmul.mubr.msk.f32.gmra.mxu0 %vm1057_vm3, %v1047_v2 }
 0x200   : > { %1870 = vmatprep.mubr.msk.f32.mxu0 %vm2027_vm0, %v2026_v1  ;;  %v1048_v54 = vmul.f32 %v1031_v15, %v893_v5  ;;  %1617 = vmatprep.mubr.msk.f32.mxu1 %vm1311_vm4, %v1309_v58 }
 0x203   : > { %1871 = vmatmul.mubr.msk.f32.gmra.mxu0 %vm1057_vm3, %v1048_v54 }
 0x282   : > { %v2630_v63 = vpop.f32.mrf.mxu0 }
 0x284   : > { %v1824_v5 = vpop.f32.mrf.mxu0 }
 0x286   : > { %v2632_v3 = vpop.f32.mrf.mxu0 }
 0x288   : > { %v1827_v4 = vpop.f32.mrf.mxu0 }
 0x28a   : > { %v2634_v6 = vpop.f32.mrf.mxu0 }
 0x28c   : > { %v1830_v9 = vpop.f32.mrf.mxu0 }
 0x28e   : > { %v2636_v31 = vpop.f32.mrf.mxu0 }
 0x290   : > { %v1833_v10 = vpop.f32.mrf.mxu0 }
 0x293   : > { %v2638_v11 = vpop.f32.mrf.mxu0 }
 0x295   : > { %v1836_v24 = vpop.f32.mrf.mxu0 }
 0x297   : > { %v1200_v60 = vpop.f32.mrf.mxu0 }
 0x299   : > { %v1839_v13 = vpop.f32.mrf.mxu0 }
 0x29b   : > { %v1205_v12 = vpop.f32.mrf.mxu0 }
 0x29d   : > { %v1842_v14 = vpop.f32.mrf.mxu0 }
 0x29f   : > { %v1210_v16 = vpop.f32.mrf.mxu0 }
 0x2a1   : > { %v1845_v20 = vpop.f32.mrf.mxu0 }
 0x2a3   : > { %v1215_v21 = vpop.f32.mrf.mxu0 }
 0x2a5   : > { %v1848_v52 = vpop.f32.mrf.mxu0 }
 0x2a7   : > { %v1220_v22 = vpop.f32.mrf.mxu0 }
 0x2a9   : > { %v1851_v27 = vpop.f32.mrf.mxu0 }
 0x2ab   : > { %v1225_v28 = vpop.f32.mrf.mxu0 }
 0x2ad   : > { %v1854_v32 = vpop.f32.mrf.mxu0 }
 0x2af   : > { %v1230_v61 = vpop.f32.mrf.mxu0 }
 0x2b1   : > { %v1857_v7 = vpop.f32.mrf.mxu0 }
 0x2b3   : > { %v1235_v35 = vpop.f32.mrf.mxu0 }
 0x2b4   : > { %v1271_v54 = vadd.f32 %v1235_v35, %v2372_v41  ;;  %v1268_v41 = vadd.f32 %v1220_v22, %v2352_v33  ;;  %v1265_v33 = vadd.f32 %v1205_v12, %v2321_v8  ;;  %v1262_v8 = vadd.f32 %v2636_v31, %v2293_v50  ;;  %v1388_v12 = vld [vmem:[%s2773_s10] sm:$0x1] }
 0x2b5   : > { %v1860_v25 = vpop.f32.mrf.mxu0  ;;  %v1259_v50 = vadd.f32 %v2630_v63, %v2263_v29  ;;  %v1387_v29 = vld [vmem:[%s2772_s9 + $0x18] sm:$0xff]  ;;  %v1385_v63 = vld [vmem:[%s2772_s9 + $0x8] sm:$0xff] }
 0x2b6   : > { %v1295_v56 = vadd.f32 %v2645_v48, %v1271_v54  ;;  %v1292_v58 = vadd.f32 %v2645_v48, %v1268_v41  ;;  %v1289_v9 = vadd.f32 %v2645_v48, %v1265_v33 }
 0x2b7   : > { %v1240_v38 = vpop.f32.mrf.mxu0 }
 0x2b8   : > { %v1272_v2 = vadd.f32 %v1240_v38, %v2381_v45  ;;  %v1269_v45 = vadd.f32 %v1225_v28, %v2354_v34  ;;  %v1266_v34 = vadd.f32 %v1210_v16, %v2333_v18  ;;  %v1263_v18 = vadd.f32 %v2638_v11, %v2303_v57 }
 0x2b9   : > { %v1863_v26 = vpop.f32.mrf.mxu0  ;;  %v1260_v57 = vadd.f32 %v2632_v3, %v2273_v36  ;;  %v1286_v11 = vadd.f32 %v2645_v48, %v1262_v8  ;;  %v1283_v36 = vadd.f32 %v2645_v48, %v1259_v50 }
 0x2ba   : > { %v1296_v55 = vadd.f32 %v2645_v48, %v1272_v2  ;;  %v1293_v40 = vadd.f32 %v2645_v48, %v1269_v45  ;;  %v1290_v4 = vadd.f32 %v2645_v48, %v1266_v34  ;;  %v1287_v24 = vadd.f32 %v2645_v48, %v1263_v18 }
 0x2bb   : > { %v1245_v62 = vpop.f32.mrf.mxu0 }
 0x2bc   : > { %v1273_v46 = vadd.f32 %v1245_v62, %v2390_v47 }
 0x2bd   : > { %v1866_v37 = vpop.f32.mrf.mxu0 }
 0x2be   : > { %v1297_v19 = vadd.f32 %v2645_v48, %v1273_v46 }
 0x2bf   : > { %v1250_v42 = vpop.f32.mrf.mxu0 }
 0x2c0   : > { %v1274_v44 = vadd.f32 %v1250_v42, %v2398_v51  ;;  %v1270_v51 = vadd.f32 %v1230_v61, %v2363_v30  ;;  %v1267_v30 = vadd.f32 %v1215_v21, %v2341_v23  ;;  %v1264_v23 = vadd.f32 %v1200_v60, %v2313_v0 }
 0x2c1   : > { %v1869_v49 = vpop.f32.mrf.mxu0  ;;  %v1261_v0 = vadd.f32 %v2634_v6, %v2283_v43  ;;  %v1284_v43 = vadd.f32 %v2645_v48, %v1260_v57 }
 0x2c2   : > { %v1298_v53 = vadd.f32 %v2645_v48, %v1274_v44  ;;  %v1294_v39 = vadd.f32 %v2645_v48, %v1270_v51  ;;  %v1291_v5 = vadd.f32 %v2645_v48, %v1267_v30  ;;  %v1288_v10 = vadd.f32 %v2645_v48, %v1264_v23 }
 0x2c3   : > { %v1255_v15 = vpop.f32.mrf.mxu0  ;;  %v1285_v31 = vadd.f32 %v2645_v48, %v1261_v0 }
 0x2c4   : > { %1315 = vmatpush1.msra.mxu1 %v1298_v53  ;;  %v1275_v6 = vadd.f32 %v1255_v15, %v2331_v17  ;;  %v1386_v17 = vld [vmem:[%s2772_s9 + $0x10] sm:$0xff] }
 0x2c5   : > { %1316 = vmatprep.subr.mxu1 %v2026_v1  ;;  %v1872_v47 = vpop.f32.mrf.mxu0 }
 0x2c6   : > { %1317 = vmatpush1.msra.mxu1 %v1297_v19  ;;  %v1299_v3 = vadd.f32 %v2645_v48, %v1275_v6 }
 0x2c7   : > { %1318 = vmatprep.subr.mxu1 %v2026_v1 }
 0x2c8   : > { %1319 = vmatpush1.msra.mxu1 %v1296_v55 }
 0x2c9   : > { %1320 = vmatprep.subr.mxu1 %v2026_v1 }
 0x2ca   : > { %1321 = vmatpush1.msra.mxu1 %v1295_v56 }
 0x2cb   : > { %1322 = vmatprep.subr.mxu1 %v2026_v1 }
 0x2cc   : > { %1323 = vmatpush1.msra.mxu1 %v1294_v39 }
 0x2cd   : > { %1324 = vmatprep.subr.mxu1 %v2026_v1 }
 0x2ce   : > { %1325 = vmatpush1.msra.mxu1 %v1293_v40 }
 0x2cf   : > { %1326 = vmatprep.subr.mxu1 %v2026_v1 }
 0x2d0   : > { %1327 = vmatpush1.msra.mxu1 %v1292_v58 }
 0x2d1   : > { %1328 = vmatprep.subr.mxu1 %v2026_v1 }
 0x2d2   : > { %1329 = vmatpush1.msra.mxu1 %v1291_v5 }
 0x2d3   : > { %1330 = vmatprep.subr.mxu1 %v2026_v1 }
 0x2d4   : > { %1331 = vmatpush1.msra.mxu1 %v1290_v4 }
 0x2d5   : > { %1332 = vmatprep.subr.mxu1 %v2026_v1 }
 0x2d6   : > { %1333 = vmatpush1.msra.mxu1 %v1289_v9 }
 0x2d7   : > { %1334 = vmatprep.subr.mxu1 %v2026_v1 }
 0x2d8   : > { %1335 = vmatpush1.msra.mxu1 %v1288_v10 }
 0x2d9   : > { %1336 = vmatprep.subr.mxu1 %v2026_v1 }
 0x2da   : > { %1337 = vmatpush1.msra.mxu1 %v1287_v24 }
 0x2db   : > { %1338 = vmatprep.subr.mxu1 %v2026_v1 }
 0x2dc   : > { %1339 = vmatpush1.msra.mxu1 %v1286_v11 }
 0x2dd   : > { %1340 = vmatprep.subr.mxu1 %v2026_v1 }
 0x2de   : > { %1341 = vmatpush1.msra.mxu1 %v1285_v31 }
 0x2df   : > { %1342 = vmatprep.subr.mxu1 %v2026_v1 }
 0x2e0   : > { %1343 = vmatpush1.msra.mxu1 %v1284_v43 }
 0x2e1   : > { %1344 = vmatprep.subr.mxu1 %v2026_v1 }
 0x2e2   : > { %1345 = vmatpush1.msra.mxu1 %v1283_v36 }
 0x2e3   : > { %1376 = vmatprep.subr.mxu1 %v2026_v1 }
 0x2e4   : > { %1377 = vmatpush2.msra.mxu1 %v1299_v3 }
 0x2e5   : > { %1379 = vmatmul.mubr.f32.vlgmr.msra.gmra.mxu1 %v2628_v59  ;;  %1873 = vmatprep.subr.mxu1 %v2026_v1  ;;  %v1384_v59 = vld [vmem:[%s2772_s9] sm:$0xff] }
 0x2e6   : > { %1874 = vmatpush3.msra.mxu1 %v1387_v29  ;;  %1881 = vmatprep.mubr.msk.f32.mxu1 %vm2027_vm0, %v2026_v1 }
 0x2e7   : > { %1875 = vmatprep.subr.mxu1 %v2026_v1 }
 0x2e8   : > { %1876 = vmatpush3.msra.mxu1 %v1386_v17 }
 0x2e9   : > { %1877 = vmatprep.subr.mxu1 %v2026_v1 }
 0x2ea   : > { %1878 = vmatpush3.msra.mxu1 %v1385_v63 }
 0x2eb   : > { %1879 = vmatprep.subr.mxu1 %v2026_v1 }
 0x2ec   : > { %1880 = vmatpush3.msra.mxu1 %v1384_v59 }
 0x3a5   : > { %v1380_v60 = vpop.f32.mrf.mxu1 }
 0x3a6   : > { %1882 = vmatmul.mubr.msk.f32.vlgmr.msra.gmra.mxu1 %vm694_vm2, %v1380_v60 }
 0x3a7   : > { %v1382_v13 = vpop.f32.mrf.mxu1 }
 0x466   : > { %v1458_v14 = vpop.f32.mrf.mxu1 }
 0x467   : > { %v1459_v1 = vadd.f32 %v1458_v14, %v1388_v12 }
 0x468   : > { %v1883_v16 = vpop.f32.mrf.mxu1 }
 0x469   : > { %1463 = vst.msk [vmem:[%s406_s22] sm:$0x1] %vm1462_vm5, %v1459_v1 }
 0x46a   : > { %1977 = shalt.err (!%p1974_p3)
}
 0x46b   : > { %s1978_s16 = scalar_lea.hbm %s2728_s30, 16  ;;  %s1982_s25 = scalar_lea.hbm %s2774_s11, 32 }
 0x46c   : > { %p1979_p4 = scmp.ne.s32.totalorder %s2728_s30, %s1978_s16  ;;  %p1983_p9 = scmp.lt.s32.totalorder %s2728_s30, %s2774_s11 }
 0x46d   : > { %p1984_p10 = scmp.lt.s32.totalorder %s1982_s25, %s1978_s16 }
 0x46e   : > { %p1980_p7 = pnand %p1979_p4, %p2127_p5 }
 0x46f   : > { %p1985_p11 = por %p1984_p10, %p1983_p9 }
 0x470   : > { %p1981_p8 = pneg %p1980_p7 }
 0x472   : > { %p1986_p12 = pnand %p1985_p11, %p1981_p8 }
 0x474   : > { %1989 = shalt.err (!%p1986_p12)
}
 0x475   : > { %1889 = dma.vmem_to_hbm [thread:$0]  (%p2127_p5), %s1478_s24, 16, %s2728_s30, %s1465_s12  }
 0x476 PF: > { %p1895_p13 = scmp.ge.s32.totalorder %s2024_s20, 2  ;;  %s1489_s0 = sand.u32 1, %s2012_s17  }
 0x477   : > { %s1490_s14 = scalar_lea.sflag [#allocation3], %s1489_s0 }
 0x478   : > { %p1892_p0 = pnand %p1895_p13, %p2131_p6 }
 0x47a   : > { %p1893_p1 = pneg %p1892_p0 }
 0x47c   : > { %2007 = dma.done.wait (%p1893_p1), %s1490_s14, 16  }
 0x47d   : > { %2009 = vsyncadd (%p1893_p1), %s1490_s14, 4294967280  ;;  %p21_p2 = scmp.ge.s32.totalorder %s2114_s23, 4   ;;  %s2779_s17 = smov %s2016_s18 }
 0x47e   : > { %s2780_s18 = smov %s2020_s19  ;;  %s2781_s19 = smov %s2125_s26 }
 0x47f   : > { %s2782_s20 = smov %s2114_s23  ;;  %23 = sbr.rel (!%p21_p2) target bundleno = 5 (0x5), region = 105 }
 0x484   :  { %1494 = vsyncpa [#allocation3], 1 }
 0x485   :  { %1496 = vsyncpa [#allocation3 + $0x1], 1 }

</bundles_post_ra>
